<compile_context>
chip_gen: v7x
topology: tpu7x:2x2x1
jax: 0.10.0
libtpu: 0.0.40
codegen_flags: <defaults>
</compile_context>

<pallas_src>
import jax
import jax.numpy as jnp
from jax.experimental import pallas as pl
from jax.experimental.pallas import tpu as pltpu


_TILE = 512                    # 128-multiple tile: lane-dense output stores
_SMALL_PLANE_BYTES = 2 << 20   # below this, move whole (S, H) planes per step
_SMALL_BLOCK_BYTES = 2 << 20   # target bytes per block on the small-shape path


def _transpose_kernel(x_ref, o_ref):
    # x_ref: (BT, TS, TH) VMEM tile; o_ref: (BT, TH, TS) VMEM tile.
    # Swapping the last two axes lowers to an XLU transpose on TPU.
    o_ref[...] = jnp.swapaxes(x_ref[...], 1, 2)


def _tile(dim: int) -> int:
    # Full-dim block when it fits (full-extent blocks waive the (8,128)
    # divisibility rule, so awkward sizes like 300 are handled); otherwise a
    # 512-wide, 128-aligned tile (edge blocks are padded/masked by Pallas).
    return dim if dim <= _TILE else _TILE


def transpose_pallas(x: jax.Array, dim0: int = 1, dim1: int = 2) -> jax.Array:
    """Pallas equivalent of Transpose(shape=(dim0, dim1)).

    The (1, 2) pair of a 3-D (B, S, H) tensor — the canonical use of this
    wrapper inside nn.Sequential — runs through the Pallas kernel.  Any other
    rank / axis pair falls back to XLA's transpose (same semantics).
    """
    # TODO(synk): other axis pairs / ranks are pure layout ops; they are routed
    # through XLA rather than a dedicated Pallas kernel.
    if x.ndim != 3 or {dim0 % x.ndim, dim1 % x.ndim} != {1, 2}:
        return jnp.swapaxes(x, dim0, dim1)

    B, S, H = x.shape
    itemsize = jnp.dtype(x.dtype).itemsize
    plane_bytes = S * H * itemsize

    if plane_bytes <= _SMALL_PLANE_BYTES:
        # Small-plane path: whole (S, H) plane(s) per grid step, folding
        # several batch elements into one block to amortize per-step overhead.
        bt = max(1, min(B, _SMALL_BLOCK_BYTES // max(plane_bytes, 1)))
        grid = (pl.cdiv(B, bt),)
        in_specs = [pl.BlockSpec((bt, S, H), lambda b: (b, 0, 0))]
        out_specs = pl.BlockSpec((bt, H, S), lambda b: (b, 0, 0))
        dim_semantics = ("parallel",)
    else:
        # Tiled path: bounded VMEM, lane-dense output stores.
        ts = _tile(S)
        th = _tile(H)
        grid = (B, pl.cdiv(S, ts), pl.cdiv(H, th))
        in_specs = [pl.BlockSpec((1, ts, th), lambda b, i, j: (b, i, j))]
        out_specs = pl.BlockSpec((1, th, ts), lambda b, i, j: (b, j, i))
        dim_semantics = ("parallel", "parallel", "parallel")

    return pl.pallas_call(
        _transpose_kernel,
        out_shape=jax.ShapeDtypeStruct((B, H, S), x.dtype),
        grid_spec=pl.GridSpec(
            grid=grid,
            in_specs=in_specs,
            out_specs=out_specs,
        ),
        compiler_params=pltpu.CompilerParams(
            dimension_semantics=dim_semantics,
        ),
        # Pure memory-bound op: read + write of the whole tensor, zero FLOPs.
        cost_estimate=pl.CostEstimate(
            flops=0,
            transcendentals=0,
            bytes_accessed=2 * B * S * H * itemsize,
        ),
    )(x)


if __name__ == "__main__":
    key = jax.random.PRNGKey(0)
    k_small, k_tiled = jax.random.split(key)

    # 1) Small shape matching the module's typical Sequential use:
    #    batch=2, seq=8, hidden=32  (exercises the folded full-plane path).
    x_small = jax.random.normal(k_small, (2, 8, 32), dtype=jnp.float32)
    out_small = jax.block_until_ready(transpose_pallas(x_small, 1, 2))
    ref_small = jnp.swapaxes(x_small, 1, 2)
    assert out_small.shape == (2, 32, 8), out_small.shape
    assert out_small.dtype == x_small.dtype
    assert jnp.array_equal(out_small, ref_small), "small-path mismatch"

    # 2) Moderate shape that exercises the tiled path with non-divisible
    #    edge blocks (640 = 512 + 128, 896 = 512 + 384).
    x_tiled = jax.random.normal(k_tiled, (1, 640, 896), dtype=jnp.float32)
    out_tiled = jax.block_until_ready(transpose_pallas(x_tiled, 1, 2))
    ref_tiled = jnp.swapaxes(x_tiled, 1, 2)
    assert out_tiled.shape == (1, 896, 640), out_tiled.shape
    assert jnp.array_equal(out_tiled, ref_tiled), "tiled-path mismatch"

    print("KERNEL_OK")
</pallas_src>

<mosaic_0001>
module attributes {stable_mosaic.version = 11 : i64} {
  func.func @_transpose_kernel(%arg0: i32, %arg1: memref<2x8x32xf32, #tpu.memory_space<vmem>>, %arg2: memref<2x32x8xf32, #tpu.memory_space<vmem>>) attributes {dimension_semantics = [#tpu.dimension_semantics<parallel>], iteration_bounds = array<i64: 1>, scalar_prefetch = 0 : i64, scratch_operands = 0 : i64, tpu.core_type = #tpu.core_type<tc>, window_params = [{transform_indices = @transform_0, window_bounds = array<i64: 2, 8, 32>}, {transform_indices = @transform_1, window_bounds = array<i64: 2, 32, 8>}]} {
    %c0 = arith.constant 0 : index
    %c0_0 = arith.constant 0 : index
    %c0_1 = arith.constant 0 : index
    %0 = vector.load %arg1[%c0, %c0_0, %c0_1] : memref<2x8x32xf32, #tpu.memory_space<vmem>>, vector<2x8x32xf32>
    %1 = tpu.transpose %0, [0, 2, 1] : vector<2x8x32xf32> -> vector<2x32x8xf32>
    %c0_2 = arith.constant 0 : index
    %c0_3 = arith.constant 0 : index
    %c0_4 = arith.constant 0 : index
    %2 = vector.load %arg2[%c0_2, %c0_3, %c0_4] : memref<2x32x8xf32, #tpu.memory_space<vmem>>, vector<2x32x8xf32>
    tpu.vector_store %arg2[%c0_2, %c0_3, %c0_4], %1 {strides = array<i32>} : memref<2x32x8xf32, #tpu.memory_space<vmem>>, vector<2x32x8xf32>,
    return
  }
  func.func @transform_0(%arg0: i32) -> (i32, i32, i32) {
    %c0_i32 = arith.constant 0 : i32
    %c0_i32_0 = arith.constant 0 : i32
    %c0_i32_1 = arith.constant 0 : i32
    return %arg0, %c0_i32, %c0_i32_0 : i32, i32, i32
  }
  func.func @transform_1(%arg0: i32) -> (i32, i32, i32) {
    %c0_i32 = arith.constant 0 : i32
    %c0_i32_0 = arith.constant 0 : i32
    %c0_i32_1 = arith.constant 0 : i32
    return %arg0, %c0_i32, %c0_i32_0 : i32, i32, i32
  }
}

</mosaic_0001>

<bundles_post_ra>
// kernel: tpu_custom_call.1
= control target key start
LH: loop header
LB: loop body
LE: loop exit
PB: predicated region body
PF: predicated region fallthrough
CT: control target
= control target key end

     0   :  { %6 = vsyncpa [#allocation3], 0  ;;  %s130_s6 = smov [#allocation2]   ;;  %s187_s0 = inlined_call_operand.hbm [shape: f32[2,8,32], index: 0, kind: input, shape index: {}]   ;;  %s188_s1 = inlined_call_operand.vmem [shape: f32[2,32,8], index: 1, kind: output, shape index: {}]  }
   0x1   :  { %s12_s7 = sshll.u32 %s130_s6, 4  ;;  %s106_s10 = scalar_lea.hbm %s187_s0, 256  ;;  %s13_s7 = int_to_ptr.vmem [resolvable:$true] %s12_s7 }
   0x2   :  { %p107_p0 = scmp.ne.s32.totalorder %s187_s0, %s106_s10  ;;  %p110_p1 = scmp.lt.u32.totalorder %s106_s10, %s187_s0 }
   0x4   :  { %p112_p2 = pnand %p110_p1, %p107_p0 }
   0x6   :  { %115 = shalt.err (!%p112_p2)
}
   0x7   :  { %s116_s15 = scalar_lea.vmem %s13_s7, 256  ;;  %p121_p4 = scmp.lt.s32.totalorder %s13_s7, %s13_s7 }
   0x8   :  { %p117_p3 = scmp.ne.s32.totalorder %s13_s7, %s116_s15  ;;  %p122_p5 = scmp.lt.s32.totalorder %s116_s15, %s116_s15 }
   0xa   :  { %p123_p6 = por %p122_p5, %p121_p4 }
   0xc   :  { %p124_p7 = pnand %p123_p6, %p117_p3 }
   0xe   :  { %127 = shalt.err (!%p124_p7)
}
   0xf   :  { %s131_s16 = smov 128   ;;  %s132_s17 = smov 8  }
  0x10   :  { %18 = dma.hbm_to_vmem [thread:$0]  %s187_s0, 256, %s13_s7, [#allocation3], %s131_s16, %s131_s16, %s132_s17  }
  0x11   :  { %128 = dma.done.wait [#allocation3], 256  }
  0x12   :  { %129 = vsyncadd [#allocation3], 4294967040  ;;  %v22_v0 = vld [vmem:[#allocation2] sm:$0xff]  ;;  %v23_v1 = vld [vmem:[#allocation2 + $0x8] sm:$0xff]  ;;  %vm88_vm0 = vcmask 64512  }
  0x13   :  { %24 = vxpose.xlu0.b32.start.end [1/1] (short) (narrow) %v22_v0, 32 }
  0x20   :  { %56 = vxpose.xlu0.b32.start.end [1/1] (short) (narrow) %v23_v1, 32 }
  0x93   :  { %v40_v2 = vpop.trf.xlu0 }
  0x94   :  { %89 = vst.msk [vmem:[%s188_s1] sm:$0xff] %vm88_vm0, %v40_v2 }
  0x97   :  { %v41_v3 = vpop.trf.xlu0 }
  0x98   :  { %90 = vst.msk [vmem:[%s188_s1 + $0x8] sm:$0xff] %vm88_vm0, %v41_v3 }
  0x9b   :  { %v42_v4 = vpop.trf.xlu0 }
  0x9c   :  { %91 = vst.msk [vmem:[%s188_s1 + $0x10] sm:$0xff] %vm88_vm0, %v42_v4 }
  0x9f   :  { %v43_v5 = vpop.trf.xlu0 }
  0xa0   :  { %92 = vst.msk [vmem:[%s188_s1 + $0x18] sm:$0xff] %vm88_vm0, %v43_v5 }
  0xa3   :  { %v72_v6 = vpop.trf.xlu0 }
  0xa4   :  { %93 = vst.msk [vmem:[%s188_s1 + $0x20] sm:$0xff] %vm88_vm0, %v72_v6 }
  0xa7   :  { %v73_v7 = vpop.trf.xlu0 }
  0xa8   :  { %94 = vst.msk [vmem:[%s188_s1 + $0x28] sm:$0xff] %vm88_vm0, %v73_v7 }
  0xab   :  { %v74_v8 = vpop.trf.xlu0 }
  0xac   :  { %95 = vst.msk [vmem:[%s188_s1 + $0x30] sm:$0xff] %vm88_vm0, %v74_v8 }
  0xaf   :  { %v75_v9 = vpop.trf.xlu0 }
  0xb0   :  { %96 = vst.msk [vmem:[%s188_s1 + $0x38] sm:$0xff] %vm88_vm0, %v75_v9 }
  0xb1   :  { %101 = vsyncpa [#allocation3], 1 }

</bundles_post_ra>
